<compile_context>
chip_gen: v6e
topology: v6e:2x2x1
jax: 0.10.0
libtpu: 0.0.40
codegen_flags: <defaults>
</compile_context>

<pallas_src>
import jax
import jax.numpy as jnp
from jax.experimental import pallas as pl
from jax.experimental.pallas import tpu as pltpu

INPUT_DIM = 3
OUTPUT_DIM = 1
HID = 128                      # padded hidden width (sublane axis of h)
LANE = 128                     # batch tile granularity (lane axis of h)
LAYER_DIMS = [INPUT_DIM, 128, 64, 32, 16, OUTPUT_DIM]


def _round_up(n, m):
    return ((n + m - 1) // m) * m


def qnet_kernel(xT_ref,
                w1_ref, b1_ref,
                w2_ref, b2_ref,
                w3_ref, b3_ref,
                w4_ref, b4_ref,
                w5_ref, b5_ref,
                o_ref):
    """One batch tile, batch on lanes: (3, TB) -> (1, TB).

    Hidden activations are (128, TB); widths 64/32/16 are zero-padded to 128,
    which is bit-exact through ReLU and contributes nothing downstream.
    """
    x = xT_ref[...].astype(jnp.float32)          # (3, TB); matches x.type(float32)
    w1 = w1_ref[...]                             # (128, 3) f32

    # ---- Linear(3 -> 128) + ReLU: three rank-1 broadcast updates (VPU, f32) ----
    h = (w1[:, 0:1] * x[0:1, :]
         + w1[:, 1:2] * x[1:2, :]
         + w1[:, 2:3] * x[2:3, :]
         + b1_ref[...])
    h = jnp.maximum(h, 0.0)

    # ---- Linear(128 -> 64) + ReLU: bf16 MXU matmul, f32 accumulation ----
    h = jnp.dot(w2_ref[...], h.astype(jnp.bfloat16),
                preferred_element_type=jnp.float32) + b2_ref[...]
    h = jnp.maximum(h, 0.0)

    # ---- Linear(64 -> 32) + ReLU ----
    h = jnp.dot(w3_ref[...], h.astype(jnp.bfloat16),
                preferred_element_type=jnp.float32) + b3_ref[...]
    h = jnp.maximum(h, 0.0)

    # ---- Linear(32 -> 16) + ReLU ----
    h = jnp.dot(w4_ref[...], h.astype(jnp.bfloat16),
                preferred_element_type=jnp.float32) + b4_ref[...]
    h = jnp.maximum(h, 0.0)

    # ---- Linear(16 -> 1): VPU multiply + cross-sublane reduce (XLU), f32 ----
    out = jnp.sum(h * w5_ref[...], axis=0, keepdims=True) + b5_ref[...]
    o_ref[...] = out.astype(o_ref.dtype)         # (1, TB): lane-dense store


def _pad_params(params):
    """Pad hidden widths to 128; MXU weights -> bf16, everything else f32."""
    (w1, b1), (w2, b2), (w3, b3), (w4, b4), (w5, b5) = params
    f32, bf16 = jnp.float32, jnp.bfloat16

    def pad_w(w, dtype):                         # (out, in) -> (HID, HID)
        w = w.astype(f32)
        w = jnp.pad(w, ((0, HID - w.shape[0]), (0, HID - w.shape[1])))
        return w.astype(dtype)                   # padded zeros stay exactly 0

    def pad_b(b):                                # (out,) -> (HID, 1) f32
        b = b.astype(f32).reshape(-1, 1)
        return jnp.pad(b, ((0, HID - b.shape[0]), (0, 0)))

    return (
        w1.astype(f32),          pad_b(b1),      # (128, 3) f32, (128, 1) f32
        pad_w(w2, bf16),         pad_b(b2),      # (128, 128) bf16
        pad_w(w3, bf16),         pad_b(b3),
        pad_w(w4, bf16),         pad_b(b4),
        pad_b(w5.reshape(-1)),   b5.astype(f32).reshape(1, 1),  # (128,1), (1,1)
    )


def qnet_forward(x, params, *, block_batch=2048):
    """x: (B, 3); returns (B, 1) float32 (QNET.forward semantics)."""
    B = x.shape[0]
    assert x.shape[1] == INPUT_DIM

    padded = _pad_params(params)

    # Balanced, lane-aligned batch tiles.  Use >=2 tiles when the batch can be
    # split so dimension_semantics=("parallel",) actually shards across both
    # v7x TensorCores; cap tile size at block_batch (keeps v5e comfortably
    # inside its 16 MiB scoped-VMEM default -- working set ~3 MiB at 2048).
    min_tiles = 2 if B >= 2 * LANE else 1
    n_tiles = max(min_tiles, pl.cdiv(B, block_batch))
    tb = _round_up(pl.cdiv(B, n_tiles), LANE)
    Bp = n_tiles * tb

    xT = jnp.transpose(x.astype(jnp.float32))    # (3, B): batch on lanes
    if Bp != B:
        xT = jnp.pad(xT, ((0, 0), (0, Bp - B)))  # padded cols sliced off below

    const = lambda i: (0, 0)                     # weights stay VMEM-resident
    weight_specs = [
        pl.BlockSpec((HID, INPUT_DIM), const), pl.BlockSpec((HID, 1), const),
        pl.BlockSpec((HID, HID), const),       pl.BlockSpec((HID, 1), const),
        pl.BlockSpec((HID, HID), const),       pl.BlockSpec((HID, 1), const),
        pl.BlockSpec((HID, HID), const),       pl.BlockSpec((HID, 1), const),
        pl.BlockSpec((HID, 1), const),         pl.BlockSpec((1, 1), const),
    ]

    # Advisory cost hint for XLA's scheduler.
    mac = sum(LAYER_DIMS[i] * LAYER_DIMS[i + 1] for i in range(len(LAYER_DIMS) - 1))
    weight_bytes = int(sum(int(p.size) * p.dtype.itemsize for p in padded))
    cost = pl.CostEstimate(
        flops=2 * Bp * mac,
        transcendentals=0,
        bytes_accessed=int(Bp * INPUT_DIM * 4 + Bp * OUTPUT_DIM * 4 + weight_bytes),
    )

    out = pl.pallas_call(
        qnet_kernel,
        out_shape=jax.ShapeDtypeStruct((OUTPUT_DIM, Bp), jnp.float32),
        grid=(n_tiles,),
        in_specs=[pl.BlockSpec((INPUT_DIM, tb), lambda i: (0, i))] + weight_specs,
        out_specs=pl.BlockSpec((OUTPUT_DIM, tb), lambda i: (0, i)),
        compiler_params=pltpu.CompilerParams(
            dimension_semantics=("parallel",),   # shard batch tiles across TCs
        ),
        cost_estimate=cost,
    )(xT, *padded)

    # (1, Bp) -> (B, 1).  Padded batch columns hold garbage (bias -> ReLU
    # propagates through the zero-padded inputs), so the slice is required.
    return out[:, :B].reshape(B, OUTPUT_DIM)


def init_params(key):
    """PyTorch nn.Linear default init: U(-k, k), k = 1/sqrt(fan_in).
    Weights in torch (out_features, in_features) orientation."""
    params = []
    for i in range(len(LAYER_DIMS) - 1):
        fan_in, fan_out = LAYER_DIMS[i], LAYER_DIMS[i + 1]
        key, kw, kb = jax.random.split(key, 3)
        bound = 1.0 / (fan_in ** 0.5)
        w = jax.random.uniform(kw, (fan_out, fan_in), jnp.float32, -bound, bound)
        b = jax.random.uniform(kb, (fan_out,), jnp.float32, -bound, bound)
        params.append((w, b))
    return params


def reference_forward(x, params):
    h = x.astype(jnp.float32)
    for i, (w, b) in enumerate(params):
        h = h @ w.T + b
        if i < len(params) - 1:
            h = jnp.maximum(h, 0.0)
    return h


if __name__ == "__main__":
    root = jax.random.PRNGKey(0)
    root, kparams = jax.random.split(root)
    params = init_params(kparams)

    # batch=8 (single tile), 13 (tail padding), 300 (two "parallel" tiles)
    for batch in (8, 13, 300):
        root, kx = jax.random.split(root)
        x = jax.random.normal(kx, (batch, INPUT_DIM), dtype=jnp.float32)
        out = jax.block_until_ready(qnet_forward(x, params))
        ref = reference_forward(x, params)
        assert out.shape == (batch, OUTPUT_DIM), out.shape
        # bf16 MXU operands (f32 accumulation) => relaxed tolerance vs f32 ref.
        assert jnp.allclose(out, ref, atol=2e-2, rtol=2e-2), (
            float(jnp.max(jnp.abs(out - ref))))

    print("KERNEL_OK")
</pallas_src>

<mosaic_0001>
module attributes {stable_mosaic.version = 11 : i64} {
  func.func @qnet_kernel(%arg0: i32, %arg1: memref<3x128xf32, #tpu.memory_space<vmem>>, %arg2: memref<128x3xf32, #tpu.memory_space<vmem>>, %arg3: memref<128x1xf32, #tpu.memory_space<vmem>>, %arg4: memref<128x128xbf16, #tpu.memory_space<vmem>>, %arg5: memref<128x1xf32, #tpu.memory_space<vmem>>, %arg6: memref<128x128xbf16, #tpu.memory_space<vmem>>, %arg7: memref<128x1xf32, #tpu.memory_space<vmem>>, %arg8: memref<128x128xbf16, #tpu.memory_space<vmem>>, %arg9: memref<128x1xf32, #tpu.memory_space<vmem>>, %arg10: memref<128x1xf32, #tpu.memory_space<vmem>>, %arg11: memref<1x1xf32, #tpu.memory_space<vmem>>, %arg12: memref<1x128xf32, #tpu.memory_space<vmem>>) attributes {dimension_semantics = [#tpu.dimension_semantics<parallel>], iteration_bounds = array<i64: 1>, scalar_prefetch = 0 : i64, scratch_operands = 0 : i64, tpu.core_type = #tpu.core_type<tc>, window_params = [{transform_indices = @transform_0, window_bounds = array<i64: 3, 128>}, {pipeline_mode = #tpu.pipeline_mode<synchronous>, transform_indices = @transform_1, window_bounds = array<i64: 128, 3>}, {pipeline_mode = #tpu.pipeline_mode<synchronous>, transform_indices = @transform_2, window_bounds = array<i64: 128, 1>}, {pipeline_mode = #tpu.pipeline_mode<synchronous>, transform_indices = @transform_3, window_bounds = array<i64: 128, 128>}, {pipeline_mode = #tpu.pipeline_mode<synchronous>, transform_indices = @transform_4, window_bounds = array<i64: 128, 1>}, {pipeline_mode = #tpu.pipeline_mode<synchronous>, transform_indices = @transform_5, window_bounds = array<i64: 128, 128>}, {pipeline_mode = #tpu.pipeline_mode<synchronous>, transform_indices = @transform_6, window_bounds = array<i64: 128, 1>}, {pipeline_mode = #tpu.pipeline_mode<synchronous>, transform_indices = @transform_7, window_bounds = array<i64: 128, 128>}, {pipeline_mode = #tpu.pipeline_mode<synchronous>, transform_indices = @transform_8, window_bounds = array<i64: 128, 1>}, {pipeline_mode = #tpu.pipeline_mode<synchronous>, transform_indices = @transform_9, window_bounds = array<i64: 128, 1>}, {pipeline_mode = #tpu.pipeline_mode<synchronous>, transform_indices = @transform_10, window_bounds = array<i64: 1, 1>}, {transform_indices = @transform_11, window_bounds = array<i64: 1, 128>}]} {
    %c0 = arith.constant 0 : index
    %c0_0 = arith.constant 0 : index
    %0 = vector.load %arg1[%c0, %c0_0] : memref<3x128xf32, #tpu.memory_space<vmem>>, vector<3x128xf32>
    %c0_1 = arith.constant 0 : index
    %c0_2 = arith.constant 0 : index
    %1 = vector.load %arg2[%c0_1, %c0_2] : memref<128x3xf32, #tpu.memory_space<vmem>>, vector<128x3xf32>
    %2 = vector.extract_strided_slice %1 {offsets = [0, 0], sizes = [128, 1], strides = [1, 1]} : vector<128x3xf32> to vector<128x1xf32>
    %3 = vector.extract_strided_slice %0 {offsets = [0, 0], sizes = [1, 128], strides = [1, 1]} : vector<3x128xf32> to vector<1x128xf32>
    %4 = vector.broadcast %2 : vector<128x1xf32> to vector<128x128xf32>
    %5 = vector.broadcast %3 : vector<1x128xf32> to vector<128x128xf32>
    %6 = arith.mulf %4, %5 : vector<128x128xf32>
    %7 = vector.extract_strided_slice %1 {offsets = [0, 1], sizes = [128, 1], strides = [1, 1]} : vector<128x3xf32> to vector<128x1xf32>
    %8 = vector.extract_strided_slice %0 {offsets = [1, 0], sizes = [1, 128], strides = [1, 1]} : vector<3x128xf32> to vector<1x128xf32>
    %9 = vector.broadcast %7 : vector<128x1xf32> to vector<128x128xf32>
    %10 = vector.broadcast %8 : vector<1x128xf32> to vector<128x128xf32>
    %11 = arith.mulf %9, %10 : vector<128x128xf32>
    %12 = arith.addf %6, %11 : vector<128x128xf32>
    %13 = vector.extract_strided_slice %1 {offsets = [0, 2], sizes = [128, 1], strides = [1, 1]} : vector<128x3xf32> to vector<128x1xf32>
    %14 = vector.extract_strided_slice %0 {offsets = [2, 0], sizes = [1, 128], strides = [1, 1]} : vector<3x128xf32> to vector<1x128xf32>
    %15 = vector.broadcast %13 : vector<128x1xf32> to vector<128x128xf32>
    %16 = vector.broadcast %14 : vector<1x128xf32> to vector<128x128xf32>
    %17 = arith.mulf %15, %16 : vector<128x128xf32>
    %18 = arith.addf %12, %17 : vector<128x128xf32>
    %c0_3 = arith.constant 0 : index
    %c0_4 = arith.constant 0 : index
    %19 = vector.load %arg3[%c0_3, %c0_4] : memref<128x1xf32, #tpu.memory_space<vmem>>, vector<128x1xf32>
    %20 = vector.broadcast %19 : vector<128x1xf32> to vector<128x128xf32>
    %21 = arith.addf %18, %20 : vector<128x128xf32>
    %cst = arith.constant 0.000000e+00 : f32
    %22 = vector.broadcast %cst : f32 to vector<128x128xf32>
    %23 = arith.maximumf %21, %22 : vector<128x128xf32>
    %c0_5 = arith.constant 0 : index
    %c0_6 = arith.constant 0 : index
    %24 = vector.load %arg4[%c0_5, %c0_6] : memref<128x128xbf16, #tpu.memory_space<vmem>>, vector<128x128xbf16>
    %25 = arith.truncf %23 : vector<128x128xf32> to vector<128x128xbf16>
    %cst_7 = arith.constant dense<0.000000e+00> : vector<128x128xf32>
    %26 = tpu.matmul %24, %25, %cst_7 {dimension_numbers = #tpu.dot_dimension_numbers<[1], [0], [0], [1], [0, 0, 1, 1], [], []>} : vector<128x128xbf16>, vector<128x128xbf16>, vector<128x128xf32> -> vector<128x128xf32>
    %c0_8 = arith.constant 0 : index
    %c0_9 = arith.constant 0 : index
    %27 = vector.load %arg5[%c0_8, %c0_9] : memref<128x1xf32, #tpu.memory_space<vmem>>, vector<128x1xf32>
    %28 = vector.broadcast %27 : vector<128x1xf32> to vector<128x128xf32>
    %29 = arith.addf %26, %28 : vector<128x128xf32>
    %cst_10 = arith.constant 0.000000e+00 : f32
    %30 = vector.broadcast %cst_10 : f32 to vector<128x128xf32>
    %31 = arith.maximumf %29, %30 : vector<128x128xf32>
    %c0_11 = arith.constant 0 : index
    %c0_12 = arith.constant 0 : index
    %32 = vector.load %arg6[%c0_11, %c0_12] : memref<128x128xbf16, #tpu.memory_space<vmem>>, vector<128x128xbf16>
    %33 = arith.truncf %31 : vector<128x128xf32> to vector<128x128xbf16>
    %cst_13 = arith.constant dense<0.000000e+00> : vector<128x128xf32>
    %34 = tpu.matmul %32, %33, %cst_13 {dimension_numbers = #tpu.dot_dimension_numbers<[1], [0], [0], [1], [0, 0, 1, 1], [], []>} : vector<128x128xbf16>, vector<128x128xbf16>, vector<128x128xf32> -> vector<128x128xf32>
    %c0_14 = arith.constant 0 : index
    %c0_15 = arith.constant 0 : index
    %35 = vector.load %arg7[%c0_14, %c0_15] : memref<128x1xf32, #tpu.memory_space<vmem>>, vector<128x1xf32>
    %36 = vector.broadcast %35 : vector<128x1xf32> to vector<128x128xf32>
    %37 = arith.addf %34, %36 : vector<128x128xf32>
    %cst_16 = arith.constant 0.000000e+00 : f32
    %38 = vector.broadcast %cst_16 : f32 to vector<128x128xf32>
    %39 = arith.maximumf %37, %38 : vector<128x128xf32>
    %c0_17 = arith.constant 0 : index
    %c0_18 = arith.constant 0 : index
    %40 = vector.load %arg8[%c0_17, %c0_18] : memref<128x128xbf16, #tpu.memory_space<vmem>>, vector<128x128xbf16>
    %41 = arith.truncf %39 : vector<128x128xf32> to vector<128x128xbf16>
    %cst_19 = arith.constant dense<0.000000e+00> : vector<128x128xf32>
    %42 = tpu.matmul %40, %41, %cst_19 {dimension_numbers = #tpu.dot_dimension_numbers<[1], [0], [0], [1], [0, 0, 1, 1], [], []>} : vector<128x128xbf16>, vector<128x128xbf16>, vector<128x128xf32> -> vector<128x128xf32>
    %c0_20 = arith.constant 0 : index
    %c0_21 = arith.constant 0 : index
    %43 = vector.load %arg9[%c0_20, %c0_21] : memref<128x1xf32, #tpu.memory_space<vmem>>, vector<128x1xf32>
    %44 = vector.broadcast %43 : vector<128x1xf32> to vector<128x128xf32>
    %45 = arith.addf %42, %44 : vector<128x128xf32>
    %cst_22 = arith.constant 0.000000e+00 : f32
    %46 = vector.broadcast %cst_22 : f32 to vector<128x128xf32>
    %47 = arith.maximumf %45, %46 : vector<128x128xf32>
    %c0_23 = arith.constant 0 : index
    %c0_24 = arith.constant 0 : index
    %48 = vector.load %arg10[%c0_23, %c0_24] : memref<128x1xf32, #tpu.memory_space<vmem>>, vector<128x1xf32>
    %49 = vector.broadcast %48 : vector<128x1xf32> to vector<128x128xf32>
    %50 = arith.mulf %47, %49 : vector<128x128xf32>
    %cst_25 = arith.constant dense<0.000000e+00> : vector<128xf32>
    %51 = vector.multi_reduction <add>, %50, %cst_25 [0] : vector<128x128xf32> to vector<128xf32>
    %52 = vector.shape_cast %51 : vector<128xf32> to vector<1x128xf32>
    %c0_26 = arith.constant 0 : index
    %c0_27 = arith.constant 0 : index
    %53 = vector.load %arg11[%c0_26, %c0_27] : memref<1x1xf32, #tpu.memory_space<vmem>>, vector<1x1xf32>
    %54 = vector.broadcast %53 : vector<1x1xf32> to vector<1x128xf32>
    %55 = arith.addf %52, %54 : vector<1x128xf32>
    %c0_28 = arith.constant 0 : index
    %c0_29 = arith.constant 0 : index
    %56 = vector.load %arg12[%c0_28, %c0_29] : memref<1x128xf32, #tpu.memory_space<vmem>>, vector<1x128xf32>
    tpu.vector_store %arg12[%c0_28, %c0_29], %55 {strides = array<i32>} : memref<1x128xf32, #tpu.memory_space<vmem>>, vector<1x128xf32>,
    return
  }
  func.func @transform_0(%arg0: i32) -> (i32, i32) {
    %c0_i32 = arith.constant 0 : i32
    %c0_i32_0 = arith.constant 0 : i32
    return %c0_i32, %arg0 : i32, i32
  }
  func.func @transform_1(%arg0: i32) -> (i32, i32) {
    %c0_i32 = arith.constant 0 : i32
    %c0_i32_0 = arith.constant 0 : i32
    %c0_i32_1 = arith.constant 0 : i32
    return %c0_i32, %c0_i32_0 : i32, i32
  }
  func.func @transform_2(%arg0: i32) -> (i32, i32) {
    %c0_i32 = arith.constant 0 : i32
    %c0_i32_0 = arith.constant 0 : i32
    %c0_i32_1 = arith.constant 0 : i32
    return %c0_i32, %c0_i32_0 : i32, i32
  }
  func.func @transform_3(%arg0: i32) -> (i32, i32) {
    %c0_i32 = arith.constant 0 : i32
    %c0_i32_0 = arith.constant 0 : i32
    %c0_i32_1 = arith.constant 0 : i32
    return %c0_i32, %c0_i32_0 : i32, i32
  }
  func.func @transform_4(%arg0: i32) -> (i32, i32) {
    %c0_i32 = arith.constant 0 : i32
    %c0_i32_0 = arith.constant 0 : i32
    %c0_i32_1 = arith.constant 0 : i32
    return %c0_i32, %c0_i32_0 : i32, i32
  }
  func.func @transform_5(%arg0: i32) -> (i32, i32) {
    %c0_i32 = arith.constant 0 : i32
    %c0_i32_0 = arith.constant 0 : i32
    %c0_i32_1 = arith.constant 0 : i32
    return %c0_i32, %c0_i32_0 : i32, i32
  }
  func.func @transform_6(%arg0: i32) -> (i32, i32) {
    %c0_i32 = arith.constant 0 : i32
    %c0_i32_0 = arith.constant 0 : i32
    %c0_i32_1 = arith.constant 0 : i32
    return %c0_i32, %c0_i32_0 : i32, i32
  }
  func.func @transform_7(%arg0: i32) -> (i32, i32) {
    %c0_i32 = arith.constant 0 : i32
    %c0_i32_0 = arith.constant 0 : i32
    %c0_i32_1 = arith.constant 0 : i32
    return %c0_i32, %c0_i32_0 : i32, i32
  }
  func.func @transform_8(%arg0: i32) -> (i32, i32) {
    %c0_i32 = arith.constant 0 : i32
    %c0_i32_0 = arith.constant 0 : i32
    %c0_i32_1 = arith.constant 0 : i32
    return %c0_i32, %c0_i32_0 : i32, i32
  }
  func.func @transform_9(%arg0: i32) -> (i32, i32) {
    %c0_i32 = arith.constant 0 : i32
    %c0_i32_0 = arith.constant 0 : i32
    %c0_i32_1 = arith.constant 0 : i32
    return %c0_i32, %c0_i32_0 : i32, i32
  }
  func.func @transform_10(%arg0: i32) -> (i32, i32) {
    %c0_i32 = arith.constant 0 : i32
    %c0_i32_0 = arith.constant 0 : i32
    %c0_i32_1 = arith.constant 0 : i32
    return %c0_i32, %c0_i32_0 : i32, i32
  }
  func.func @transform_11(%arg0: i32) -> (i32, i32) {
    %c0_i32 = arith.constant 0 : i32
    %c0_i32_0 = arith.constant 0 : i32
    return %c0_i32, %arg0 : i32, i32
  }
}

</mosaic_0001>

<bundles_post_ra>
// kernel: tpu_custom_call.1
= control target key start
LH: loop header
LB: loop body
LE: loop exit
PB: predicated region body
PF: predicated region fallthrough
CT: control target
= control target key end

     0   :  { %s2371_s0 = inlined_call_operand.vmem [shape: f32[3,128], index: 0, kind: input, shape index: {}]   ;;  %s2372_s1 = inlined_call_operand.vmem [shape: f32[128,3], index: 1, kind: input, shape index: {}]   ;;  %s2373_s2 = inlined_call_operand.vmem [shape: f32[128,1], index: 2, kind: input, shape index: {}]   ;;  %s2374_s3 = inlined_call_operand.vmem [shape: bf16[128,128], index: 3, kind: input, shape index: {}]   ;;  %s2375_s4 = inlined_call_operand.vmem [shape: f32[128,1], index: 4, kind: input, shape index: {}]   ;;  %s2376_s5 = inlined_call_operand.vmem [shape: bf16[128,128], index: 5, kind: input, shape index: {}]   ;;  %s2377_s6 = inlined_call_operand.vmem [shape: f32[128,1], index: 6, kind: input, shape index: {}]   ;;  %s2378_s7 = inlined_call_operand.vmem [shape: bf16[128,128], index: 7, kind: input, shape index: {}]   ;;  %s2379_s8 = inlined_call_operand.vmem [shape: f32[128,1], index: 8, kind: input, shape index: {}]   ;;  %s2380_s9 = inlined_call_operand.vmem [shape: f32[128,1], index: 9, kind: input, shape index: {}]   ;;  %s2381_s10 = inlined_call_operand.<no memory space> [shape: f32[1,1], index: 10, kind: input, shape index: {}]   ;;  %s2382_s11 = inlined_call_operand.hbm [shape: f32[1,128], index: 11, kind: output, shape index: {}]  }
   0x1   :  { %v16_v0 = vstv %s2381_s10 }
   0x2   :  { %17 = vst [vmem:[#allocation2] sm:$0x1] %v16_v0 }
   0x3   :  { %v57_v1 = vld [vmem:[%s2372_s1 + $0x70] sm:$0xff]  ;;  %v1750_v2 = vmov 2   ;;  %v1751_v3 = vmov 1   ;;  %v58_v4 = vld [vmem:[%s2372_s1 + $0x78] sm:$0xff]  ;;  %v55_v5 = vld [vmem:[%s2372_s1 + $0x60] sm:$0xff]  ;;  %v1752_v8 = vmov 0  }
   0x4   :  { %1678 = vset.pattern.permute.xlu0 %v1750_v2  ;;  %1677 = vset.pattern.permute.xlu1 %v1751_v3  ;;  %v54_v6 = vld [vmem:[%s2372_s1 + $0x58] sm:$0xff]  ;;  %v53_v7 = vld [vmem:[%s2372_s1 + $0x50] sm:$0xff]  ;;  %v52_v9 = vld [vmem:[%s2372_s1 + $0x48] sm:$0xff] }
   0x5   :  { %316 = vperm.xlu0 %1678, %v57_v1   ;;  %216 = vperm.xlu1 %1677, %v57_v1   ;;  %v1843_v10 = vld [vmem:[%s2372_s1 + $0x38] sm:$0xff]  ;;  %v56_v11 = vld [vmem:[%s2372_s1 + $0x68] sm:$0xff] }
   0x6   :  { %v1853_v12 = vld [vmem:[%s2372_s1 + $0x28] sm:$0xff]  ;;  %v1859_v13 = vld [vmem:[%s2372_s1 + $0x18] sm:$0xff] }
   0x9   :  { %220 = vperm.xlu1 %1677, %v58_v4   ;;  %308 = vperm.xlu0 %1678, %v55_v5  }
   0xd   :  { %1679 = vset.pattern.permute.xlu1 %v1750_v2  ;;  %304 = vperm.xlu0 %1678, %v54_v6  }
   0xe   :  { %320 = vperm.xlu1 %1679, %v58_v4  }
  0x11   :  { %1686 = vset.pattern.permute.xlu0 %v1751_v3 }
  0x12   :  { %1680 = vset.pattern.permute.xlu1 %v1752_v8  ;;  %200 = vperm.xlu0 %1686, %v53_v7  }
  0x13   :  { %121 = vperm.xlu1 %1680, %v55_v5  }
  0x16   :  { %196 = vperm.xlu0 %1686, %v52_v9  }
  0x17   :  { %1681 = vset.pattern.permute.xlu1 %v1751_v3 }
  0x18   :  { %208 = vperm.xlu1 %1681, %v55_v5  }
  0x1a   :  { %188 = vperm.xlu0 %1686, %v1843_v10  }
  0x1c   :  { %212 = vperm.xlu1 %1681, %v56_v11  }
  0x1e   :  { %180 = vperm.xlu0 %1686, %v1853_v12  }
  0x20   :  { %1682 = vset.pattern.permute.xlu1 %v1750_v2 }
  0x21   :  { %312 = vperm.xlu1 %1682, %v56_v11  }
  0x22   :  { %172 = vperm.xlu0 %1686, %v1859_v13  }
  0x23   :  { %18 = vsyncpa [#allocation4], 0  ;;  %v373_v14 = vld [vmem:[%s2373_s2 + $0x70] sm:$0xff]  ;;  %v1869_v15 = vld [vmem:[%s2372_s1 + $0x8] sm:$0xff]  ;;  %v139_v56 = vlaneseq }
  0x24   :  { %v374_v16 = vld [vmem:[%s2373_s2 + $0x78] sm:$0xff]  ;;  %v51_v17 = vld [vmem:[%s2372_s1 + $0x40] sm:$0xff]  ;;  %v369_v19 = vld [vmem:[%s2373_s2 + $0x50] sm:$0xff] }
  0x25   :  { %1683 = vset.pattern.permute.xlu1 %v1752_v8  ;;  %v371_v18 = vld [vmem:[%s2373_s2 + $0x60] sm:$0xff]  ;;  %v372_v20 = vld [vmem:[%s2373_s2 + $0x68] sm:$0xff]  ;;  %v365_v22 = vld [vmem:[%s2373_s2 + $0x30] sm:$0xff]  ;;  %v2012_v61 = vshrl.u32 %v139_v56, 7 }
  0x26   :  { %447 = vperm.xlu1 %1683, %v373_v14   ;;  %164 = vperm.xlu0 %1686, %v1869_v15   ;;  %v367_v21 = vld [vmem:[%s2373_s2 + $0x40] sm:$0xff]  ;;  %v370_v24 = vld [vmem:[%s2373_s2 + $0x58] sm:$0xff]  ;;  %v49_v25 = vld [vmem:[%s2372_s1 + $0x30] sm:$0xff] }
  0x27   :  { %v363_v23 = vld [vmem:[%s2373_s2 + $0x20] sm:$0xff]  ;;  %v361_v26 = vld [vmem:[%s2373_s2 + $0x10] sm:$0xff]  ;;  %v360_v27 = vld [vmem:[%s2373_s2 + $0x8] sm:$0xff] }
  0x28   :  { %v526_v28 = vld [vmem:[%s2375_s4 + $0x78] sm:$0xff]  ;;  %v524_v29 = vld [vmem:[%s2375_s4 + $0x68] sm:$0xff]  ;;  %v47_v32 = vld [vmem:[%s2372_s1 + $0x20] sm:$0xff] }
  0x29   :  { %v368_v30 = vld [vmem:[%s2373_s2 + $0x48] sm:$0xff]  ;;  %v522_v31 = vld [vmem:[%s2375_s4 + $0x58] sm:$0xff]  ;;  %v45_v44 = vld [vmem:[%s2372_s1 + $0x10] sm:$0xff] }
  0x2a   :  { %111 = vperm.xlu1 %1683, %v53_v7   ;;  %1701 = vset.pattern.permute.xlu0 %v1752_v8  ;;  %v520_v33 = vld [vmem:[%s2375_s4 + $0x48] sm:$0xff]  ;;  %v518_v34 = vld [vmem:[%s2375_s4 + $0x38] sm:$0xff]  ;;  %v42_v5 = vld [vmem:[%s2371_s0] sm:$0x7] }
  0x2b   :  { %131 = vperm.xlu0 %1701, %v57_v1   ;;  %v516_v35 = vld [vmem:[%s2375_s4 + $0x28] sm:$0xff]  ;;  %v514_v36 = vld [vmem:[%s2375_s4 + $0x18] sm:$0xff]  ;;  %v43_v1 = vld [vmem:[%s2372_s1] sm:$0xff] }
  0x2c   :  { %v512_v39 = vld [vmem:[%s2375_s4 + $0x8] sm:$0xff]  ;;  %v366_v40 = vld [vmem:[%s2373_s2 + $0x38] sm:$0xff] }
  0x2d   :  { %v807_v43 = vld [vmem:[%s2377_s6 + $0x78] sm:$0xff]  ;;  %v805_v46 = vld [vmem:[%s2377_s6 + $0x68] sm:$0xff] }
  0x2e   :  { %116 = vperm.xlu1 %1683, %v54_v6   ;;  %v803_v48 = vld [vmem:[%s2377_s6 + $0x58] sm:$0xff]  ;;  %v801_v51 = vld [vmem:[%s2377_s6 + $0x48] sm:$0xff] }
  0x2f   :  { %136 = vperm.xlu0 %1701, %v58_v4   ;;  %v799_v54 = vld [vmem:[%s2377_s6 + $0x38] sm:$0xff]  ;;  %v797_v58 = vld [vmem:[%s2377_s6 + $0x28] sm:$0xff]  ;;  %v225_v4 = vsub.s32 1, %v2012_v61 }
  0x30   :  { %v364_v60 = vld [vmem:[%s2373_s2 + $0x28] sm:$0xff]  ;;  %v795_v63 = vld [vmem:[%s2377_s6 + $0x18] sm:$0xff] }
  0x32   :  { %1684 = vset.pattern.permute.xlu1 %v1751_v3 }
  0x33   :  { %204 = vperm.xlu1 %1684, %v54_v6   ;;  %126 = vperm.xlu0 %1701, %v56_v11   ;;  %v793_v6 = vld [vmem:[%s2377_s6 + $0x8] sm:$0xff]  ;;  %v2035_v11 = vrot.slane %v42_v5, %v225_v4 }
  0x37   :  { %1685 = vset.pattern.permute.xlu1 %v1750_v2  ;;  %452 = vperm.xlu0 %1701, %v374_v16  }
  0x38   :  { %300 = vperm.xlu1 %1685, %v53_v7   ;;  %v141_v7 = vsub.s32 0, %v2012_v61 }
  0x3a   :  { %v2043_v14 = vrot.slane %v42_v5, %v141_v7 }
  0x3b   :  { %101 = vperm.xlu0 %1701, %v51_v17  }
  0x3c   :  { %1687 = vset.pattern.permute.xlu1 %v1752_v8 }
  0x3d   :  { %437 = vperm.xlu1 %1687, %v371_v18  }
  0x3f   :  { %427 = vperm.xlu0 %1701, %v369_v19  }
  0x41   :  { %442 = vperm.xlu1 %1687, %v372_v20  }
  0x43   :  { %96 = vperm.xlu0 %1701, %v1843_v10  }
  0x45   :  { %106 = vperm.xlu1 %1687, %v52_v9  }
  0x47   :  { %417 = vperm.xlu0 %1701, %v367_v21   ;;  %v1076_v21 = vld [vmem:[%s2379_s8 + $0x18] sm:$0xff] }
  0x49   :  { %1688 = vset.pattern.permute.xlu1 %v1751_v3 }
  0x4a   :  { %192 = vperm.xlu1 %1688, %v51_v17  }
  0x4b   :  { %86 = vperm.xlu0 %1701, %v1853_v12  }
  0x4e   :  { %1689 = vset.pattern.permute.xlu1 %v1750_v2 }
  0x4f   :  { %292 = vperm.xlu1 %1689, %v51_v17   ;;  %407 = vperm.xlu0 %1701, %v365_v22  }
  0x53   :  { %296 = vperm.xlu1 %1689, %v52_v9   ;;  %76 = vperm.xlu0 %1701, %v1859_v13  }
  0x57   :  { %1690 = vset.pattern.permute.xlu1 %v1752_v8  ;;  %397 = vperm.xlu0 %1701, %v363_v23  }
  0x58   :  { %432 = vperm.xlu1 %1690, %v370_v24  }
  0x5b   :  { %66 = vperm.xlu0 %1701, %v1869_v15  }
  0x5c   :  { %91 = vperm.xlu1 %1690, %v49_v25  }
  0x5f   :  { %387 = vperm.xlu0 %1701, %v361_v26  }
  0x60   :  { %1691 = vset.pattern.permute.xlu1 %v1751_v3 }
  0x61   :  { %184 = vperm.xlu1 %1691, %v49_v25  }
  0x63   :  { %382 = vperm.xlu0 %1701, %v360_v27   ;;  %v1078_v27 = vld [vmem:[%s2379_s8 + $0x28] sm:$0xff] }
  0x65   :  { %1692 = vset.pattern.permute.xlu1 %v1750_v2 }
  0x66   :  { %284 = vperm.xlu1 %1692, %v49_v25  }
  0x67   :  { %604 = vperm.xlu0 %1701, %v526_v28  }
  0x6a   :  { %288 = vperm.xlu1 %1692, %v1843_v10  }
  0x6b   :  { %594 = vperm.xlu0 %1701, %v524_v29  }
  0x6e   :  { %1693 = vset.pattern.permute.xlu1 %v1752_v8 }
  0x6f   :  { %422 = vperm.xlu1 %1693, %v368_v30   ;;  %584 = vperm.xlu0 %1701, %v522_v31  }
  0x73   :  { %81 = vperm.xlu1 %1693, %v47_v32   ;;  %574 = vperm.xlu0 %1701, %v520_v33  }
  0x77   :  { %1694 = vset.pattern.permute.xlu1 %v1751_v3  ;;  %564 = vperm.xlu0 %1701, %v518_v34  }
  0x78   :  { %176 = vperm.xlu1 %1694, %v47_v32  }
  0x7b   :  { %554 = vperm.xlu0 %1701, %v516_v35   ;;  %v362_v35 = vld [vmem:[%s2373_s2 + $0x18] sm:$0xff] }
  0x7c   :  { %1695 = vset.pattern.permute.xlu1 %v1750_v2 }
  0x7d   :  { %276 = vperm.xlu1 %1695, %v47_v32  }
  0x7f   :  { %544 = vperm.xlu0 %1701, %v514_v36  }
  0x80   :  { %v1953_v37 = vpop.permute.xlu1 %216  ;;  %v1955_v38 = vpop.permute.xlu0 %316 }
  0x81   :  { %280 = vperm.xlu1 %1695, %v1853_v12   ;;  %v325_v12 = vsub.s32 2, %v2012_v61  ;;  %v241_v18 = vmul.f32 %v2035_v11, %v1953_v37 }
  0x83   :  { %534 = vperm.xlu0 %1701, %v512_v39   ;;  %v2050_v19 = vrot.slane %v42_v5, %v325_v12  ;;  %v523_v5 = vld [vmem:[%s2375_s4 + $0x60] sm:$0xff] }
  0x84   :  { %v1964_v41 = vpop.permute.xlu1 %220  ;;  %v1966_v42 = vpop.permute.xlu0 %308 }
  0x85   :  { %1696 = vset.pattern.permute.xlu1 %v1752_v8  ;;  %v341_v22 = vmul.f32 %v2050_v19, %v1955_v38  ;;  %v242_v25 = vmul.f32 %v2035_v11, %v1964_v41  ;;  %v339_v41 = vmul.f32 %v2050_v19, %v1966_v42  ;;  %v1334_v42 = vld [vmem:[%s2380_s9 + $0x20] sm:$0xff] }
  0x86   :  { %412 = vperm.xlu1 %1696, %v366_v40  }
  0x87   :  { %885 = vperm.xlu0 %1701, %v807_v43   ;;  %v1333_v43 = vld [vmem:[%s2380_s9 + $0x18] sm:$0xff] }
  0x88   :  { %v1975_v45 = vpop.permute.xlu0 %304 }
  0x89   :  { %v1980_v47 = vpop.permute.xlu1 %320 }
  0x8a   :  { %71 = vperm.xlu1 %1696, %v45_v44   ;;  %v342_v32 = vmul.f32 %v2050_v19, %v1980_v47 }
  0x8b   :  { %875 = vperm.xlu0 %1701, %v805_v46  }
  0x8d   :  { %v1985_v49 = vpop.permute.xlu0 %200 }
  0x8e   :  { %v1987_v50 = vpop.permute.xlu1 %121  ;;  %1697 = vset.pattern.permute.xlu1 %v1751_v3 }
  0x8f   :  { %168 = vperm.xlu1 %1697, %v45_v44   ;;  %865 = vperm.xlu0 %1701, %v803_v48   ;;  %v155_v38 = vmul.f32 %v2043_v14, %v1987_v50  ;;  %v359_v48 = vld [vmem:[%s2373_s2] sm:$0xff] }
  0x91   :  { %v1993_v52 = vpop.permute.xlu0 %196 }
  0x93   :  { %v209_v53 = vpop.permute.xlu1 %208  ;;  %1698 = vset.pattern.permute.xlu1 %v1750_v2  ;;  %855 = vperm.xlu0 %1701, %v801_v51  }
  0x94   :  { %268 = vperm.xlu1 %1698, %v45_v44   ;;  %v239_v33 = vmul.f32 %v2035_v11, %v209_v53 }
  0x95   :  { %v1999_v55 = vpop.permute.xlu0 %188 }
  0x96   :  { %v255_v44 = vadd.f32 %v239_v33, %v155_v38 }
  0x97   :  { %v2001_v57 = vpop.permute.xlu1 %212  ;;  %845 = vperm.xlu0 %1701, %v799_v54  }
  0x98   :  { %272 = vperm.xlu1 %1698, %v1859_v13   ;;  %v1074_v13 = vld [vmem:[%s2379_s8 + $0x8] sm:$0xff]  ;;  %v240_v46 = vmul.f32 %v2035_v11, %v2001_v57  ;;  %v355_v56 = vadd.f32 %v339_v41, %v255_v44  ;;  %v525_v57 = vld [vmem:[%s2375_s4 + $0x70] sm:$0xff]  ;;  %v511_v41 = vld [vmem:[%s2375_s4] sm:$0xff] }
  0x99   :  { %v2007_v59 = vpop.permute.xlu0 %180 }
  0x9b   :  { %835 = vperm.xlu0 %1701, %v797_v58  }
  0x9c   :  { %v2014_v62 = vpop.permute.xlu1 %312  ;;  %1699 = vset.pattern.permute.xlu1 %v1752_v8 }
  0x9d   :  { %402 = vperm.xlu1 %1699, %v364_v60   ;;  %v2020_v0 = vpop.permute.xlu0 %172  ;;  %v340_v54 = vmul.f32 %v2050_v19, %v2014_v62  ;;  %v1335_v62 = vld [vmem:[%s2380_s9 + $0x28] sm:$0xff] }
  0x9f   :  { %825 = vperm.xlu0 %1701, %v795_v63   ;;  %v1704_v63 = vld [vmem:[%s2374_s3] sm:$0xff]  }
  0xa0   :  { %1577 = vmatprep.mubr.bf16.mxu0 %v1704_v63 }
  0xa1   :  { %v448_v9 = vpop.permute.xlu1 %447  ;;  %61 = vperm.xlu1 %1699, %v43_v1   ;;  %v2033_v10 = vpop.permute.xlu0 %164 }
  0xa3   :  { %815 = vperm.xlu0 %1701, %v793_v6  }
  0xa5   :  { %v2045_v16 = vpop.permute.xlu1 %111  ;;  %1700 = vset.pattern.permute.xlu1 %v1751_v3 }
  0xa6   :  { %v132_v17 = vpop.permute.xlu0 %131  ;;  %160 = vperm.xlu1 %1700, %v43_v1  }
  0xa7   :  { %v157_v20 = vmul.f32 %v2043_v14, %v132_v17  ;;  %1096 = vperm.xlu0 %1701, %v1074_v13   ;;  %v1336_v13 = vld [vmem:[%s2380_s9 + $0x30] sm:$0xff] }
  0xa9   :  { %v257_v23 = vadd.f32 %v241_v18, %v157_v20  ;;  %v2058_v24 = vpop.permute.xlu1 %116  ;;  %v521_v18 = vld [vmem:[%s2375_s4 + $0x50] sm:$0xff]  ;;  %v1337_v20 = vld [vmem:[%s2380_s9 + $0x38] sm:$0xff] }
  0xaa   :  { %v137_v3 = vpop.permute.xlu0 %136  ;;  %1702 = vset.pattern.permute.xlu1 %v1750_v2  ;;  %v1331_v2 = vld [vmem:[%s2380_s9 + $0x8] sm:$0xff] }
  0xab   :  { %v158_v26 = vmul.f32 %v2043_v14, %v137_v3  ;;  %1106 = vperm.xlu0 %1701, %v1076_v21   ;;  %260 = vperm.xlu1 %1702, %v43_v1   ;;  %v357_v28 = vadd.f32 %v341_v22, %v257_v23  ;;  %v519_v22 = vld [vmem:[%s2375_s4 + $0x40] sm:$0xff] }
  0xac   :  { %v1338_v23 = vld [vmem:[%s2380_s9 + $0x40] sm:$0xff] }
  0xad   :  { %v258_v29 = vadd.f32 %v242_v25, %v158_v26  ;;  %v469_v36 = vadd.f32 %v448_v9, %v357_v28  ;;  %v517_v25 = vld [vmem:[%s2375_s4 + $0x30] sm:$0xff]  ;;  %v237_v26 = vmul.f32 %v2035_v11, %v1985_v49  ;;  %v515_v49 = vld [vmem:[%s2375_s4 + $0x20] sm:$0xff] }
  0xae   :  { %v2067_v30 = vpop.permute.xlu1 %204  ;;  %v127_v31 = vpop.permute.xlu0 %126 }
  0xaf   :  { %1116 = vperm.xlu0 %1701, %v1078_v27   ;;  %264 = vperm.xlu1 %1702, %v1869_v15   ;;  %v358_v34 = vadd.f32 %v342_v32, %v258_v29  ;;  %v156_v39 = vmul.f32 %v2043_v14, %v127_v31  ;;  %v485_v50 = vmax.f32 %v469_v36, 0.0  ;;  %v153_v27 = vmul.f32 %v2043_v14, %v2045_v16  ;;  %v1340_v36 = vld [vmem:[%s2380_s9 + $0x50] sm:$0xff] }
  0xb0   :  { %v238_v28 = vmul.f32 %v2035_v11, %v2067_v30  ;;  %v154_v31 = vmul.f32 %v2043_v14, %v2058_v24  ;;  %v338_v16 = vmul.f32 %v2050_v19, %v1975_v45 }
  0xb1   :  { %v256_v51 = vadd.f32 %v240_v46, %v156_v39  ;;  %v253_v30 = vadd.f32 %v237_v26, %v153_v27 }
  0xb2   :  { %v453_v37 = vpop.permute.xlu0 %452  ;;  %v254_v33 = vadd.f32 %v238_v28, %v154_v31  ;;  %v794_v28 = vld [vmem:[%s2377_s6 + $0x10] sm:$0xff]  ;;  %v792_v31 = vld [vmem:[%s2377_s6] sm:$0xff] }
  0xb3   :  { %v470_v40 = vadd.f32 %v453_v37, %v358_v34  ;;  %v301_v15 = vpop.permute.xlu1 %300  ;;  %1353 = vperm.xlu0 %1701, %v1331_v2   ;;  %1703 = vset.pattern.permute.xlu1 %v1752_v8  ;;  %v356_v60 = vadd.f32 %v340_v54, %v256_v51  ;;  %v1339_v2 = vld [vmem:[%s2380_s9 + $0x48] sm:$0xff]  ;;  %v513_v37 = vld [vmem:[%s2375_s4 + $0x10] sm:$0xff] }
  0xb4   :  { %392 = vperm.xlu1 %1703, %v362_v35   ;;  %v337_v32 = vmul.f32 %v2050_v19, %v301_v15  ;;  %v354_v39 = vadd.f32 %v338_v16, %v254_v33  ;;  %v1341_v15 = vld [vmem:[%s2380_s9 + $0x58] sm:$0xff] }
  0xb5   :  { %v486_v47 = vmax.f32 %v470_v40, 0.0 }
  0xb6   :  { %v102_v3 = vpop.permute.xlu0 %101  ;;  %v353_v24 = vadd.f32 %v337_v32, %v253_v30 }
  0xb7   :  { %1363 = vperm.xlu0 %1701, %v1333_v43   ;;  %v510_v8 = vpack.c.bf16 %v486_v47, %v485_v50  ;;  %v806_v50 = vld [vmem:[%s2377_s6 + $0x70] sm:$0xff] }
  0xb8   :  { %v438_v53 = vpop.permute.xlu1 %437  ;;  %377 = vperm.xlu1 %1703, %v359_v48   ;;  %v1342_v48 = vld [vmem:[%s2380_s9 + $0x60] sm:$0xff] }
  0xb9   :  { %1561 = vmatprep.subr.bf16.mxu0 %v510_v8  ;;  %v467_v58 = vadd.f32 %v438_v53, %v355_v56  ;;  %v804_v53 = vld [vmem:[%s2377_s6 + $0x60] sm:$0xff]  ;;  %v1345_v56 = vld [vmem:[%s2380_s9 + $0x78] sm:$0xff] }
  0xba   :  { %1562 = vmatpush3.bf16.msra.mxu0 %v510_v8  ;;  %v428_v35 = vpop.permute.xlu0 %427  ;;  %v1343_v8 = vld [vmem:[%s2380_s9 + $0x68] sm:$0xff] }
  0xbb   :  { %1368 = vperm.xlu0 %1701, %v1334_v42   ;;  %v483_v6 = vmax.f32 %v467_v58, 0.0  ;;  %v465_v38 = vadd.f32 %v428_v35, %v353_v24  ;;  %v151_v42 = vmul.f32 %v2043_v14, %v102_v3  ;;  %v796_v3 = vld [vmem:[%s2377_s6 + $0x20] sm:$0xff] }
  0xbc   :  { %v443_v1 = vpop.permute.xlu1 %442  ;;  %599 = vperm.xlu1 %1703, %v525_v57   ;;  %v1073_v35 = vld [vmem:[%s2379_s8] sm:$0xff] }
  0xbd   :  { %v468_v4 = vadd.f32 %v443_v1, %v356_v60  ;;  %v481_v43 = vmax.f32 %v465_v38, 0.0  ;;  %v802_v60 = vld [vmem:[%s2377_s6 + $0x50] sm:$0xff]  ;;  %v236_v1 = vmul.f32 %v2035_v11, %v1993_v52 }
  0xbe   :  { %v97_v63 = vpop.permute.xlu0 %96  ;;  %v798_v52 = vld [vmem:[%s2377_s6 + $0x30] sm:$0xff] }
  0xbf   :  { %v484_v9 = vmax.f32 %v468_v4, 0.0  ;;  %1373 = vperm.xlu0 %1701, %v1335_v62  }
  0xc0   :  { %v2110_v12 = vpop.permute.xlu1 %106  ;;  %589 = vperm.xlu1 %1703, %v523_v5  }
  0xc1   :  { %v509_v17 = vpack.c.bf16 %v484_v9, %v483_v6  ;;  %v152_v62 = vmul.f32 %v2043_v14, %v2110_v12 }
  0xc3   :  { %1378 = vperm.xlu0 %1701, %v1336_v13   ;;  %1563 = vmatprep.subr.bf16.mxu0 %v509_v17  ;;  %v800_v13 = vld [vmem:[%s2377_s6 + $0x40] sm:$0xff] }
  0xc4   :  { %579 = vperm.xlu1 %1703, %v521_v18   ;;  %1564 = vmatpush3.bf16.msra.mxu0 %v509_v17  ;;  %v252_v17 = vadd.f32 %v236_v1, %v152_v62  ;;  %v418_v18 = vpop.permute.xlu0 %417 }
  0xc5   :  { %v193_v21 = vpop.permute.xlu1 %192 }
  0xc6   :  { %v235_v54 = vmul.f32 %v2035_v11, %v193_v21 }
  0xc7   :  { %1383 = vperm.xlu0 %1701, %v1337_v20  }
  0xc8   :  { %569 = vperm.xlu1 %1703, %v519_v22   ;;  %v251_v4 = vadd.f32 %v235_v54, %v151_v42  ;;  %v1079_v54 = vld [vmem:[%s2379_s8 + $0x30] sm:$0xff] }
  0xca   :  { %v293_v29 = vpop.permute.xlu1 %292 }
  0xcb   :  { %1388 = vperm.xlu0 %1701, %v1338_v23   ;;  %v335_v57 = vmul.f32 %v2050_v19, %v293_v29 }
  0xcc   :  { %559 = vperm.xlu1 %1703, %v517_v25  }
  0xcd   :  { %v351_v5 = vadd.f32 %v335_v57, %v251_v4  ;;  %v1080_v4 = vld [vmem:[%s2379_s8 + $0x38] sm:$0xff] }
  0xce   :  { %v297_v34 = vpop.permute.xlu1 %296 }
  0xcf   :  { %1393 = vperm.xlu0 %1701, %v1339_v2   ;;  %v336_v6 = vmul.f32 %v2050_v19, %v297_v34  ;;  %v463_v20 = vadd.f32 %v418_v18, %v351_v5  ;;  %v234_v2 = vmul.f32 %v2035_v11, %v1999_v55  ;;  %v87_v34 = vpop.permute.xlu0 %86  ;;  %v1075_v55 = vld [vmem:[%s2379_s8 + $0x10] sm:$0xff] }
  0xd0   :  { %549 = vperm.xlu1 %1703, %v515_v49   ;;  %v150_v49 = vmul.f32 %v2043_v14, %v97_v63  ;;  %v232_v63 = vmul.f32 %v2035_v11, %v2007_v59  ;;  %v148_v1 = vmul.f32 %v2043_v14, %v87_v34  ;;  %v228_v34 = vmul.f32 %v2035_v11, %v2033_v10 }
  0xd1   :  { %v352_v21 = vadd.f32 %v336_v6, %v252_v17  ;;  %v479_v25 = vmax.f32 %v463_v20, 0.0  ;;  %v1081_v17 = vld [vmem:[%s2379_s8 + $0x40] sm:$0xff] }
  0xd3   :  { %v433_v40 = vpop.permute.xlu1 %432  ;;  %1398 = vperm.xlu0 %1701, %v1340_v36   ;;  %v250_v36 = vadd.f32 %v234_v2, %v150_v49  ;;  %v1085_v49 = vld [vmem:[%s2379_s8 + $0x60] sm:$0xff] }
  0xd4   :  { %v466_v45 = vadd.f32 %v433_v40, %v354_v39  ;;  %539 = vperm.xlu1 %1703, %v513_v37   ;;  %v408_v40 = vpop.permute.xlu0 %407 }
  0xd6   :  { %v482_v44 = vmax.f32 %v466_v45, 0.0 }
  0xd7   :  { %v92_v46 = vpop.permute.xlu1 %91  ;;  %1403 = vperm.xlu0 %1701, %v1341_v15  }
  0xd8   :  { %529 = vperm.xlu1 %1703, %v511_v41   ;;  %v508_v47 = vpack.c.bf16 %v482_v44, %v481_v43  ;;  %v149_v16 = vmul.f32 %v2043_v14, %v92_v46  ;;  %v1077_v43 = vld [vmem:[%s2379_s8 + $0x20] sm:$0xff] }
  0xda   :  { %1565 = vmatprep.subr.bf16.mxu0 %v508_v47 }
  0xdb   :  { %1408 = vperm.xlu0 %1701, %v1342_v48   ;;  %1566 = vmatpush3.bf16.msra.mxu0 %v508_v47 }
  0xdc   :  { %v185_v51 = vpop.permute.xlu1 %184  ;;  %880 = vperm.xlu1 %1703, %v806_v50   ;;  %v1330_v50 = vld [vmem:[%s2380_s9] sm:$0xff] }
  0xdd   :  { %v233_v32 = vmul.f32 %v2035_v11, %v185_v51 }
  0xdf   :  { %1413 = vperm.xlu0 %1701, %v1343_v8   ;;  %v249_v24 = vadd.f32 %v233_v32, %v149_v16  ;;  %v1332_v8 = vld [vmem:[%s2380_s9 + $0x10] sm:$0xff] }
  0xe0   :  { %870 = vperm.xlu1 %1703, %v804_v53  }
  0xe1   :  { %v285_v58 = vpop.permute.xlu1 %284 }
  0xe2   :  { %v333_v30 = vmul.f32 %v2050_v19, %v285_v58 }
  0xe3   :  { %1423 = vperm.xlu0 %1701, %v1345_v56  }
  0xe4   :  { %860 = vperm.xlu1 %1703, %v802_v60   ;;  %v349_v37 = vadd.f32 %v333_v30, %v249_v24  ;;  %v77_v60 = vpop.permute.xlu0 %76 }
  0xe5   :  { %v289_v9 = vpop.permute.xlu1 %288 }
  0xe6   :  { %v334_v38 = vmul.f32 %v2050_v19, %v289_v9  ;;  %v461_v15 = vadd.f32 %v408_v40, %v349_v37  ;;  %v1086_v37 = vld [vmem:[%s2379_s8 + $0x68] sm:$0xff] }
  0xe8   :  { %850 = vperm.xlu1 %1703, %v800_v13   ;;  %v350_v45 = vadd.f32 %v334_v38, %v250_v36  ;;  %v477_v46 = vmax.f32 %v461_v15, 0.0  ;;  %v248_v13 = vadd.f32 %v232_v63, %v148_v1  ;;  %v398_v18 = vpop.permute.xlu0 %397 }
  0xea   :  { %v423_v12 = vpop.permute.xlu1 %422 }
  0xeb   :  { %v464_v22 = vadd.f32 %v423_v12, %v352_v21  ;;  %v1082_v12 = vld [vmem:[%s2379_s8 + $0x48] sm:$0xff] }
  0xec   :  { %840 = vperm.xlu1 %1703, %v798_v52  }
  0xed   :  { %v480_v23 = vmax.f32 %v464_v22, 0.0 }
  0xee   :  { %v82_v26 = vpop.permute.xlu1 %81 }
  0xef   :  { %v507_v27 = vpack.c.bf16 %v480_v23, %v479_v25  ;;  %v147_v56 = vmul.f32 %v2043_v14, %v82_v26  ;;  %v1083_v26 = vld [vmem:[%s2379_s8 + $0x50] sm:$0xff] }
  0xf0   :  { %830 = vperm.xlu1 %1703, %v796_v3  }
  0xf1   :  { %1567 = vmatprep.subr.bf16.mxu0 %v507_v27 }
  0xf2   :  { %1568 = vmatpush3.bf16.msra.mxu0 %v507_v27 }
  0xf3   :  { %v177_v29 = vpop.permute.xlu1 %176 }
  0xf4   :  { %820 = vperm.xlu1 %1703, %v794_v28   ;;  %v231_v42 = vmul.f32 %v2035_v11, %v177_v29  ;;  %v1084_v28 = vld [vmem:[%s2379_s8 + $0x58] sm:$0xff] }
  0xf6   :  { %v247_v62 = vadd.f32 %v231_v42, %v147_v56 }
  0xf8   :  { %v277_v33 = vpop.permute.xlu1 %276  ;;  %810 = vperm.xlu1 %1703, %v792_v31   ;;  %v67_v31 = vpop.permute.xlu0 %66 }
  0xf9   :  { %v331_v57 = vmul.f32 %v2050_v19, %v277_v33  ;;  %v230_v33 = vmul.f32 %v2035_v11, %v2020_v0  ;;  %v144_v24 = vmul.f32 %v2043_v14, %v67_v31 }
  0xfb   :  { %v347_v5 = vadd.f32 %v331_v57, %v247_v62  ;;  %v1463_v62 = vld [vmem:[#allocation2] sm:$0x1] }
  0xfc   :  { %v281_v39 = vpop.permute.xlu1 %280  ;;  %1091 = vperm.xlu1 %1703, %v1073_v35   ;;  %v146_v35 = vmul.f32 %v2043_v14, %v77_v60 }
  0xfd   :  { %v332_v6 = vmul.f32 %v2050_v19, %v281_v39  ;;  %v459_v20 = vadd.f32 %v398_v18, %v347_v5  ;;  %v1706_v5 = vld [vmem:[%s2374_s3 + $0x10] sm:$0xff]   ;;  %v1711_v18 = vld [vmem:[%s2374_s3 + $0x38] sm:$0xff]  }
  0xfe   :  { %v246_v0 = vadd.f32 %v230_v33, %v146_v35 }
  0xff   :  { %v348_v59 = vadd.f32 %v332_v6, %v248_v13  ;;  %v475_v22 = vmax.f32 %v459_v20, 0.0  ;;  %v1707_v6 = vld [vmem:[%s2374_s3 + $0x18] sm:$0xff]   ;;  %v1709_v13 = vld [vmem:[%s2374_s3 + $0x28] sm:$0xff]   ;;  %v1712_v20 = vld [vmem:[%s2376_s5] sm:$0xff]  }
 0x100   :  { %1101 = vperm.xlu1 %1703, %v1075_v55   ;;  %v388_v55 = vpop.permute.xlu0 %387  ;;  %1609 = vmatprep.mubr.bf16.mxu1 %v1712_v20 }
 0x101   :  { %v413_v41 = vpop.permute.xlu1 %412 }
 0x102   :  { %v462_v44 = vadd.f32 %v413_v41, %v350_v45  ;;  %v244_v45 = vadd.f32 %v228_v34, %v144_v24  ;;  %v1087_v41 = vld [vmem:[%s2379_s8 + $0x70] sm:$0xff] }
 0x104   :  { %v478_v47 = vmax.f32 %v462_v44, 0.0  ;;  %1111 = vperm.xlu1 %1703, %v1077_v43  }
 0x105   :  { %v72_v48 = vpop.permute.xlu1 %71 }
 0x106   :  { %v506_v51 = vpack.c.bf16 %v478_v47, %v477_v46  ;;  %v145_v32 = vmul.f32 %v2043_v14, %v72_v48 }
 0x108   :  { %1348 = vperm.xlu1 %1703, %v1330_v50   ;;  %1569 = vmatprep.subr.bf16.mxu0 %v506_v51 }
 0x109   :  { %1570 = vmatpush3.bf16.msra.mxu0 %v506_v51 }
 0x10a   :  { %v169_v53 = vpop.permute.xlu1 %168 }
 0x10b   :  { %v229_v29 = vmul.f32 %v2035_v11, %v169_v53 }
 0x10c   :  { %1358 = vperm.xlu1 %1703, %v1332_v8   ;;  %v383_v8 = vpop.permute.xlu0 %382 }
 0x10d   :  { %v245_v30 = vadd.f32 %v229_v29, %v145_v32 }
 0x10f   :  { %v269_v58 = vpop.permute.xlu1 %268 }
 0x110   :  { %1121 = vperm.xlu1 %1703, %v1079_v54   ;;  %v329_v2 = vmul.f32 %v2050_v19, %v269_v58 }
 0x112   :  { %v345_v36 = vadd.f32 %v329_v2, %v245_v30 }
 0x113   :  { %v273_v9 = vpop.permute.xlu1 %272 }
 0x114   :  { %1126 = vperm.xlu1 %1703, %v1080_v4   ;;  %v330_v38 = vmul.f32 %v2050_v19, %v273_v9  ;;  %v457_v15 = vadd.f32 %v388_v55, %v345_v36  ;;  %v1705_v4 = vld [vmem:[%s2374_s3 + $0x8] sm:$0xff]   ;;  %v1708_v9 = vld [vmem:[%s2374_s3 + $0x20] sm:$0xff]  }
 0x116   :  { %v346_v47 = vadd.f32 %v330_v38, %v246_v0  ;;  %v473_v42 = vmax.f32 %v457_v15, 0.0 }
 0x118   :  { %v403_v21 = vpop.permute.xlu1 %402  ;;  %1131 = vperm.xlu1 %1703, %v1081_v17   ;;  %v1710_v17 = vld [vmem:[%s2374_s3 + $0x30] sm:$0xff]  }
 0x119   :  { %v460_v52 = vadd.f32 %v403_v21, %v348_v59 }
 0x11b   :  { %v476_v23 = vmax.f32 %v460_v52, 0.0 }
 0x11c   :  { %1136 = vperm.xlu1 %1703, %v1082_v12   ;;  %v62_v3 = vpop.permute.xlu1 %61 }
 0x11d   :  { %v505_v25 = vpack.c.bf16 %v476_v23, %v475_v22  ;;  %v143_v43 = vmul.f32 %v2043_v14, %v62_v3  ;;  %v605_v22 = vpop.permute.xlu0 %604 }
 0x11f   :  { %1571 = vmatprep.subr.bf16.mxu0 %v505_v25 }
 0x120   :  { %1141 = vperm.xlu1 %1703, %v1083_v26   ;;  %1572 = vmatpush3.bf16.msra.mxu0 %v505_v25 }
 0x121   :  { %v161_v27 = vpop.permute.xlu1 %160 }
 0x122   :  { %v227_v10 = vmul.f32 %v2035_v11, %v161_v27  ;;  %v1088_v11 = vld [vmem:[%s2379_s8 + $0x78] sm:$0xff]  ;;  %v595_v27 = vpop.permute.xlu0 %594 }
 0x124   :  { %1146 = vperm.xlu1 %1703, %v1084_v28   ;;  %v243_v50 = vadd.f32 %v227_v10, %v143_v43 }
 0x126   :  { %v261_v16 = vpop.permute.xlu1 %260  ;;  %v585_v2 = vpop.permute.xlu0 %584 }
 0x127   :  { %v327_v44 = vmul.f32 %v2050_v19, %v261_v16 }
 0x128   :  { %1151 = vperm.xlu1 %1703, %v1085_v49  }
 0x129   :  { %v343_v56 = vadd.f32 %v327_v44, %v243_v50 }
 0x12a   :  { %v265_v39 = vpop.permute.xlu1 %264  ;;  %v575_v34 = vpop.permute.xlu0 %574 }
 0x12b   :  { %v328_v40 = vmul.f32 %v2050_v19, %v265_v39  ;;  %v1344_v19 = vld [vmem:[%s2380_s9 + $0x70] sm:$0xff] }
 0x12c   :  { %1156 = vperm.xlu1 %1703, %v1086_v37  }
 0x12d   :  { %v344_v46 = vadd.f32 %v328_v40, %v244_v45 }
 0x12e   :  { %v565_v15 = vpop.permute.xlu0 %564 }
 0x12f   :  { %v393_v48 = vpop.permute.xlu1 %392  ;;  %v456_v53 = vadd.f32 %v383_v8, %v344_v46 }
 0x130   :  { %v458_v51 = vadd.f32 %v393_v48, %v346_v47  ;;  %1161 = vperm.xlu1 %1703, %v1087_v41  }
 0x131   :  { %v472_v63 = vmax.f32 %v456_v53, 0.0 }
 0x132   :  { %v474_v54 = vmax.f32 %v458_v51, 0.0  ;;  %v555_v53 = vpop.permute.xlu0 %554 }
 0x133   :  { %v378_v57 = vpop.permute.xlu1 %377 }
 0x134   :  { %v504_v58 = vpack.c.bf16 %v474_v54, %v473_v42  ;;  %v455_v14 = vadd.f32 %v378_v57, %v343_v56  ;;  %1166 = vperm.xlu1 %1703, %v1088_v11  }
 0x136   :  { %v471_v60 = vmax.f32 %v455_v14, 0.0  ;;  %1573 = vmatprep.subr.bf16.mxu0 %v504_v58 }
 0x137   :  { %1574 = vmatpush3.bf16.msra.mxu0 %v504_v58  ;;  %v600_v3 = vpop.permute.xlu1 %599 }
 0x138   :  { %v503_v1 = vpack.c.bf16 %v472_v63, %v471_v60  ;;  %1418 = vperm.xlu1 %1703, %v1344_v19  }
 0x13a   :  { %1575 = vmatprep.subr.bf16.mxu0 %v503_v1 }
 0x13b   :  { %1576 = vmatpush3.bf16.msra.mxu0 %v503_v1  ;;  %v590_v29 = vpop.permute.xlu1 %589  ;;  %v545_v1 = vpop.permute.xlu0 %544 }
 0x13c   :  { %1466 = vperm.xlu1 %1703, %v1463_v62  }
 0x13e   :  { %1578 = vmatmul.mubr.bf16.vlgmr.msra.gmra.mxu0 %v1705_v4 }
 0x13f   :  { %1581 = vmatprep.mubr.bf16.mxu0 %v1706_v5  ;;  %v580_v16 = vpop.permute.xlu1 %579  ;;  %v535_v20 = vpop.permute.xlu0 %534 }
 0x143   :  { %v570_v36 = vpop.permute.xlu1 %569 }
 0x146   :  { %1582 = vmatmul.mubr.bf16.gmra.mxu0 %v1707_v6 }
 0x147   :  { %1585 = vmatprep.mubr.bf16.mxu0 %v1708_v9  ;;  %v560_v47 = vpop.permute.xlu1 %559 }
 0x14b   :  { %v550_v57 = vpop.permute.xlu1 %549 }
 0x14e   :  { %1586 = vmatmul.mubr.bf16.gmra.mxu0 %v1709_v13 }
 0x14f   :  { %1589 = vmatprep.mubr.bf16.mxu0 %v1710_v17  ;;  %v540_v5 = vpop.permute.xlu1 %539 }
 0x156   :  { %1590 = vmatmul.mubr.bf16.gmra.mxu0 %v1711_v18 }
 0x1fe   :  { %v2300_v59 = vpop.f32.mrf.mxu0 }
 0x1ff   :  { %v698_v17 = vadd.f32 %v2300_v59, %v540_v5  ;;  %v1713_v59 = vld [vmem:[%s2376_s5 + $0x8] sm:$0xff]  }
 0x200   :  { %v2302_v21 = vpop.f32.mrf.mxu0 }
 0x202   :  { %v1580_v52 = vpop.f32.mrf.mxu0 }
 0x203   :  { %v701_v6 = vadd.f32 %v1580_v52, %v545_v1 }
 0x204   :  { %v2304_v12 = vpop.f32.mrf.mxu0 }
 0x206   :  { %v1583_v23 = vpop.f32.mrf.mxu0 }
 0x207   :  { %v714_v58 = vadd.f32 %v1583_v23, %v560_v47  ;;  %v693_v23 = vadd.f32 %v2304_v12, %v535_v20  ;;  %v1714_v12 = vld [vmem:[%s2376_s5 + $0x10] sm:$0xff]  }
 0x208   :  { %v705_v25 = vpop.f32.mrf.mxu0 }
 0x209   :  { %v758_v62 = vmax.f32 %v714_v58, 0.0  ;;  %v706_v4 = vadd.f32 %v705_v25, %v550_v57  ;;  %v753_v52 = vmax.f32 %v693_v23, 0.0 }
 0x20a   :  { %v1584_v26 = vpop.f32.mrf.mxu0 }
 0x20b   :  { %v717_v42 = vadd.f32 %v1584_v26, %v565_v15  ;;  %v756_v18 = vmax.f32 %v706_v4, 0.0  ;;  %v530_v26 = vpop.permute.xlu1 %529 }
 0x20c   :  { %v708_v28 = vpop.f32.mrf.mxu0  ;;  %v690_v25 = vadd.f32 %v2302_v21, %v530_v26  ;;  %v1715_v21 = vld [vmem:[%s2376_s5 + $0x18] sm:$0xff]  }
 0x20d   :  { %v759_v19 = vmax.f32 %v717_v42, 0.0  ;;  %v709_v60 = vadd.f32 %v708_v28, %v555_v53 }
 0x20e   :  { %v1587_v31 = vpop.f32.mrf.mxu0 }
 0x20f   :  { %v730_v41 = vadd.f32 %v1587_v31, %v580_v16  ;;  %v787_v9 = vpack.c.bf16 %v759_v19, %v758_v62  ;;  %v757_v13 = vmax.f32 %v709_v60, 0.0  ;;  %v1719_v16 = vld [vmem:[%s2376_s5 + $0x38] sm:$0xff]  }
 0x210   :  { %v721_v32 = vpop.f32.mrf.mxu0 }
 0x211   :  { %v762_v8 = vmax.f32 %v730_v41, 0.0  ;;  %v722_v11 = vadd.f32 %v721_v32, %v570_v36  ;;  %v1716_v32 = vld [vmem:[%s2376_s5 + $0x20] sm:$0xff]  }
 0x212   :  { %v1588_v49 = vpop.f32.mrf.mxu0 }
 0x213   :  { %v733_v40 = vadd.f32 %v1588_v49, %v585_v2  ;;  %v760_v14 = vmax.f32 %v722_v11, 0.0  ;;  %v1717_v2 = vld [vmem:[%s2376_s5 + $0x28] sm:$0xff]   ;;  %v1718_v49 = vld [vmem:[%s2376_s5 + $0x30] sm:$0xff]  }
 0x214   :  { %v724_v30 = vpop.f32.mrf.mxu0 }
 0x215   :  { %v763_v48 = vmax.f32 %v733_v40, 0.0  ;;  %v725_v50 = vadd.f32 %v724_v30, %v575_v34  ;;  %v1720_v30 = vld [vmem:[%s2378_s7] sm:$0xff]  }
 0x216   :  { %v1591_v33 = vpop.f32.mrf.mxu0  ;;  %1641 = vmatprep.mubr.bf16.mxu0 %v1720_v30 }
 0x217   :  { %v746_v24 = vadd.f32 %v1591_v33, %v600_v3  ;;  %v789_v54 = vpack.c.bf16 %v763_v48, %v762_v8  ;;  %v761_v56 = vmax.f32 %v725_v50, 0.0  ;;  %v786_v3 = vpack.c.bf16 %v757_v13, %v756_v18  ;;  %v1721_v33 = vld [vmem:[%s2378_s7 + $0x20] sm:$0xff]  }
 0x218   :  { %v737_v35 = vpop.f32.mrf.mxu0 }
 0x219   :  { %v738_v38 = vadd.f32 %v737_v35, %v590_v29  ;;  %v766_v0 = vmax.f32 %v746_v24, 0.0  ;;  %v788_v63 = vpack.c.bf16 %v761_v56, %v760_v14  ;;  %v752_v29 = vmax.f32 %v690_v25, 0.0 }
 0x21a   :  { %v1592_v37 = vpop.f32.mrf.mxu0 }
 0x21b   :  { %v749_v39 = vadd.f32 %v1592_v37, %v605_v22  ;;  %v764_v43 = vmax.f32 %v738_v38, 0.0  ;;  %v755_v22 = vmax.f32 %v701_v6, 0.0  ;;  %v784_v31 = vpack.c.bf16 %v753_v52, %v752_v29  ;;  %v886_v37 = vpop.permute.xlu0 %885 }
 0x21c   :  { %v740_v55 = vpop.f32.mrf.mxu0 }
 0x21d   :  { %v767_v45 = vmax.f32 %v749_v39, 0.0  ;;  %v741_v10 = vadd.f32 %v740_v55, %v595_v27  ;;  %v754_v27 = vmax.f32 %v698_v17, 0.0  ;;  %v881_v39 = vpop.permute.xlu1 %880 }
 0x21f   :  { %v765_v44 = vmax.f32 %v741_v10, 0.0  ;;  %v791_v46 = vpack.c.bf16 %v767_v45, %v766_v0  ;;  %v785_v28 = vpack.c.bf16 %v755_v22, %v754_v27  ;;  %v876_v0 = vpop.permute.xlu0 %875 }
 0x221   :  { %v790_v51 = vpack.c.bf16 %v765_v44, %v764_v43  ;;  %1593 = vmatprep.subr.bf16.mxu1 %v791_v46  ;;  %v871_v10 = vpop.permute.xlu1 %870 }
 0x222   :  { %1594 = vmatpush3.bf16.msra.mxu1 %v791_v46 }
 0x223   :  { %1595 = vmatprep.subr.bf16.mxu1 %v790_v51  ;;  %v866_v43 = vpop.permute.xlu0 %865 }
 0x225   :  { %v861_v46 = vpop.permute.xlu1 %860 }
 0x226   :  { %1596 = vmatpush3.bf16.msra.mxu1 %v790_v51 }
 0x227   :  { %1597 = vmatprep.subr.bf16.mxu1 %v789_v54  ;;  %v856_v50 = vpop.permute.xlu0 %855 }
 0x229   :  { %v851_v11 = vpop.permute.xlu1 %850 }
 0x22a   :  { %1598 = vmatpush3.bf16.msra.mxu1 %v789_v54 }
 0x22b   :  { %1599 = vmatprep.subr.bf16.mxu1 %v788_v63  ;;  %v846_v60 = vpop.permute.xlu0 %845 }
 0x22d   :  { %v841_v5 = vpop.permute.xlu1 %840 }
 0x22e   :  { %1600 = vmatpush3.bf16.msra.mxu1 %v788_v63 }
 0x22f   :  { %1601 = vmatprep.subr.bf16.mxu1 %v787_v9  ;;  %v836_v20 = vpop.permute.xlu0 %835 }
 0x231   :  { %v831_v26 = vpop.permute.xlu1 %830 }
 0x232   :  { %1602 = vmatpush3.bf16.msra.mxu1 %v787_v9 }
 0x233   :  { %1603 = vmatprep.subr.bf16.mxu1 %v786_v3 }
 0x236   :  { %1604 = vmatpush3.bf16.msra.mxu1 %v786_v3 }
 0x237   :  { %1605 = vmatprep.subr.bf16.mxu1 %v785_v28 }
 0x23a   :  { %1606 = vmatpush3.bf16.msra.mxu1 %v785_v28 }
 0x23b   :  { %1607 = vmatprep.subr.bf16.mxu1 %v784_v31 }
 0x23e   :  { %1608 = vmatpush3.bf16.msra.mxu1 %v784_v31  ;;  %v826_v31 = vpop.permute.xlu0 %825 }
 0x241   :  { %1610 = vmatmul.mubr.bf16.vlgmr.msra.gmra.mxu1 %v1713_v59 }
 0x242   :  { %1613 = vmatprep.mubr.bf16.mxu1 %v1714_v12 }
 0x249   :  { %1614 = vmatmul.mubr.bf16.gmra.mxu1 %v1715_v21  ;;  %v821_v21 = vpop.permute.xlu1 %820 }
 0x24a   :  { %1617 = vmatprep.mubr.bf16.mxu1 %v1716_v32 }
 0x251   :  { %1618 = vmatmul.mubr.bf16.gmra.mxu1 %v1717_v2 }
 0x252   :  { %1621 = vmatprep.mubr.bf16.mxu1 %v1718_v49 }
 0x259   :  { %1622 = vmatmul.mubr.bf16.gmra.mxu1 %v1719_v16 }
 0x25a   :  { %1649 = vmatprep.mubr.bf16.mxu1 %v1721_v33  ;;  %v816_v33 = vpop.permute.xlu0 %815 }
 0x301   :  { %v2336_v34 = vpop.f32.mrf.mxu1 }
 0x302   :  { %v979_v16 = vadd.f32 %v2336_v34, %v821_v21 }
 0x303   :  { %v2338_v35 = vpop.f32.mrf.mxu1 }
 0x305   :  { %v2340_v24 = vpop.f32.mrf.mxu1 }
 0x306   :  { %v982_v32 = vadd.f32 %v2340_v24, %v826_v31 }
 0x307   :  { %v2342_v36 = vpop.f32.mrf.mxu1 }
 0x309   :  { %v1615_v38 = vpop.f32.mrf.mxu1 }
 0x30a   :  { %v995_v27 = vadd.f32 %v1615_v38, %v841_v5  ;;  %v974_v38 = vadd.f32 %v2342_v36, %v816_v33  ;;  %v1722_v36 = vld [vmem:[%s2378_s7 + $0x8] sm:$0xff]  }
 0x30b   :  { %v986_v55 = vpop.f32.mrf.mxu1 }
 0x30c   :  { %v1039_v59 = vmax.f32 %v995_v27, 0.0  ;;  %v987_v12 = vadd.f32 %v986_v55, %v831_v26  ;;  %v811_v55 = vpop.permute.xlu1 %810 }
 0x30d   :  { %v1616_v40 = vpop.f32.mrf.mxu1  ;;  %v971_v24 = vadd.f32 %v2338_v35, %v811_v55  ;;  %v1723_v35 = vld [vmem:[%s2378_s7 + $0x28] sm:$0xff]  }
 0x30e   :  { %v998_v22 = vadd.f32 %v1616_v40, %v846_v60  ;;  %v1037_v30 = vmax.f32 %v987_v12, 0.0  ;;  %v1035_v40 = vmax.f32 %v979_v16, 0.0 }
 0x30f   :  { %v989_v45 = vpop.f32.mrf.mxu1  ;;  %v1033_v34 = vmax.f32 %v971_v24, 0.0 }
 0x310   :  { %v1040_v28 = vmax.f32 %v998_v22, 0.0  ;;  %v990_v52 = vadd.f32 %v989_v45, %v836_v20  ;;  %v1034_v45 = vmax.f32 %v974_v38, 0.0 }
 0x311   :  { %v1619_v15 = vpop.f32.mrf.mxu1 }
 0x312   :  { %v1011_v63 = vadd.f32 %v1619_v15, %v861_v46  ;;  %v1068_v2 = vpack.c.bf16 %v1040_v28, %v1039_v59  ;;  %v1038_v49 = vmax.f32 %v990_v52, 0.0  ;;  %v1724_v15 = vld [vmem:[%s2378_s7 + $0x10] sm:$0xff]   ;;  %v1092_v46 = vpop.permute.xlu1 %1091 }
 0x313   :  { %v1002_v41 = vpop.f32.mrf.mxu1 }
 0x314   :  { %v1043_v17 = vmax.f32 %v1011_v63, 0.0  ;;  %v1003_v18 = vadd.f32 %v1002_v41, %v851_v11  ;;  %v1725_v41 = vld [vmem:[%s2378_s7 + $0x30] sm:$0xff]  }
 0x315   :  { %v1620_v44 = vpop.f32.mrf.mxu1 }
 0x316   :  { %v1014_v57 = vadd.f32 %v1620_v44, %v866_v43  ;;  %v1041_v25 = vmax.f32 %v1003_v18, 0.0  ;;  %v1726_v43 = vld [vmem:[%s2378_s7 + $0x18] sm:$0xff]  }
 0x317   :  { %v1005_v47 = vpop.f32.mrf.mxu1  ;;  %v1727_v44 = vld [vmem:[%s2378_s7 + $0x38] sm:$0xff]   ;;  %s1753_s7 = smov [#allocation3]  }
 0x318   :  { %v1044_v6 = vmax.f32 %v1014_v57, 0.0  ;;  %v1006_v9 = vadd.f32 %v1005_v47, %v856_v50  ;;  %v1097_v47 = vpop.permute.xlu0 %1096  ;;  %s1481_s28 = sshll.u32 %s1753_s7, 4  ;;  %s1482_s28 = int_to_ptr.vmem [resolvable:$true] %s1481_s28 }
 0x319   :  { %v1623_v48 = vpop.f32.mrf.mxu1  ;;  %s1728_s29 = scalar_lea.vmem %s1482_s28, 16  ;;  %s1732_s30 = scalar_lea.vmem %s1482_s28, 32 }
 0x31a   :  { %v1027_v8 = vadd.f32 %v1623_v48, %v881_v39  ;;  %v1070_v23 = vpack.c.bf16 %v1044_v6, %v1043_v17  ;;  %v1042_v3 = vmax.f32 %v1006_v9, 0.0  ;;  %v1067_v39 = vpack.c.bf16 %v1038_v49, %v1037_v30  ;;  %v1102_v48 = vpop.permute.xlu1 %1101  ;;  %p1729_p0 = scmp.ne.s32.totalorder %s1482_s28, %s1728_s29  ;;  %p1733_p1 = scmp.lt.s32.totalorder %s1482_s28, %s1482_s28 }
 0x31b   :  { %v1018_v51 = vpop.f32.mrf.mxu1  ;;  %p1734_p2 = scmp.lt.s32.totalorder %s1732_s30, %s1728_s29 }
 0x31c   :  { %v1019_v42 = vadd.f32 %v1018_v51, %v871_v10  ;;  %v1047_v58 = vmax.f32 %v1027_v8, 0.0  ;;  %v1069_v29 = vpack.c.bf16 %v1042_v3, %v1041_v25  ;;  %v1065_v10 = vpack.c.bf16 %v1034_v45, %v1033_v34  ;;  %v1107_v50 = vpop.permute.xlu0 %1106 }
 0x31d   :  { %v1624_v53 = vpop.f32.mrf.mxu1  ;;  %p1735_p3 = por %p1734_p2, %p1733_p1 }
 0x31e   :  { %v1030_v54 = vadd.f32 %v1624_v53, %v886_v37  ;;  %v1045_v1 = vmax.f32 %v1019_v42, 0.0  ;;  %v1036_v37 = vmax.f32 %v982_v32, 0.0  ;;  %v1112_v51 = vpop.permute.xlu1 %1111 }
 0x31f   :  { %v1021_v56 = vpop.f32.mrf.mxu1  ;;  %p1736_p4 = pnand %p1735_p3, %p1729_p0 }
 0x320   :  { %v1048_v14 = vmax.f32 %v1030_v54, 0.0  ;;  %v1022_v19 = vadd.f32 %v1021_v56, %v876_v0  ;;  %v1066_v0 = vpack.c.bf16 %v1036_v37, %v1035_v40  ;;  %v1117_v8 = vpop.permute.xlu0 %1116 }
 0x322   :  { %v1072_v62 = vpack.c.bf16 %v1048_v14, %v1047_v58  ;;  %v1046_v4 = vmax.f32 %v1022_v19, 0.0  ;;  %v1349_v11 = vpop.permute.xlu1 %1348 }
 0x324   :  { %v1071_v13 = vpack.c.bf16 %v1046_v4, %v1045_v1  ;;  %1625 = vmatprep.subr.bf16.mxu0 %v1072_v62  ;;  %1657 = vmatprep.subr.bf16.mxu1 %v1072_v62  ;;  %v1354_v53 = vpop.permute.xlu0 %1353 }
 0x325   :  { %1626 = vmatpush3.bf16.msra.mxu0 %v1072_v62  ;;  %1665 = vmatpush3.bf16.msra.mxu1 %v1072_v62 }
 0x326   :  { %1627 = vmatprep.subr.bf16.mxu0 %v1071_v13  ;;  %1658 = vmatprep.subr.bf16.mxu1 %v1071_v13  ;;  %v1359_v42 = vpop.permute.xlu1 %1358 }
 0x328   :  { %v1364_v54 = vpop.permute.xlu0 %1363 }
 0x329   :  { %1628 = vmatpush3.bf16.msra.mxu0 %v1071_v13  ;;  %1666 = vmatpush3.bf16.msra.mxu1 %v1071_v13 }
 0x32a   :  { %1629 = vmatprep.subr.bf16.mxu0 %v1070_v23  ;;  %1659 = vmatprep.subr.bf16.mxu1 %v1070_v23  ;;  %v1122_v56 = vpop.permute.xlu1 %1121 }
 0x32c   :  { %v1369_v57 = vpop.permute.xlu0 %1368 }
 0x32d   :  { %1630 = vmatpush3.bf16.msra.mxu0 %v1070_v23  ;;  %1667 = vmatpush3.bf16.msra.mxu1 %v1070_v23 }
 0x32e   :  { %1631 = vmatprep.subr.bf16.mxu0 %v1069_v29  ;;  %1660 = vmatprep.subr.bf16.mxu1 %v1069_v29  ;;  %v1127_v58 = vpop.permute.xlu1 %1126 }
 0x330   :  { %v1374_v14 = vpop.permute.xlu0 %1373 }
 0x331   :  { %1632 = vmatpush3.bf16.msra.mxu0 %v1069_v29  ;;  %1668 = vmatpush3.bf16.msra.mxu1 %v1069_v29 }
 0x332   :  { %1633 = vmatprep.subr.bf16.mxu0 %v1068_v2  ;;  %1661 = vmatprep.subr.bf16.mxu1 %v1068_v2  ;;  %v1132_v19 = vpop.permute.xlu1 %1131 }
 0x334   :  { %v1379_v60 = vpop.permute.xlu0 %1378 }
 0x335   :  { %1634 = vmatpush3.bf16.msra.mxu0 %v1068_v2  ;;  %1669 = vmatpush3.bf16.msra.mxu1 %v1068_v2 }
 0x336   :  { %1635 = vmatprep.subr.bf16.mxu0 %v1067_v39  ;;  %1662 = vmatprep.subr.bf16.mxu1 %v1067_v39  ;;  %v1137_v63 = vpop.permute.xlu1 %1136 }
 0x338   :  { %v1384_v1 = vpop.permute.xlu0 %1383 }
 0x339   :  { %1636 = vmatpush3.bf16.msra.mxu0 %v1067_v39  ;;  %1670 = vmatpush3.bf16.msra.mxu1 %v1067_v39 }
 0x33a   :  { %1637 = vmatprep.subr.bf16.mxu0 %v1066_v0  ;;  %1663 = vmatprep.subr.bf16.mxu1 %v1066_v0  ;;  %v1142_v62 = vpop.permute.xlu1 %1141 }
 0x33c   :  { %v1389_v6 = vpop.permute.xlu0 %1388 }
 0x33d   :  { %1638 = vmatpush3.bf16.msra.mxu0 %v1066_v0  ;;  %1671 = vmatpush3.bf16.msra.mxu1 %v1066_v0 }
 0x33e   :  { %1639 = vmatprep.subr.bf16.mxu0 %v1065_v10  ;;  %1664 = vmatprep.subr.bf16.mxu1 %v1065_v10  ;;  %v1147_v22 = vpop.permute.xlu1 %1146 }
 0x340   :  { %v1394_v26 = vpop.permute.xlu0 %1393 }
 0x341   :  { %1640 = vmatpush3.bf16.msra.mxu0 %v1065_v10  ;;  %1672 = vmatpush3.bf16.msra.mxu1 %v1065_v10 }
 0x342   :  { %v1152_v21 = vpop.permute.xlu1 %1151 }
 0x344   :  { %1642 = vmatmul.mubr.bf16.vlgmr.msra.gmra.mxu0 %v1722_v36  ;;  %1650 = vmatmul.mubr.bf16.vlgmr.msra.gmra.mxu1 %v1723_v35  ;;  %v1399_v55 = vpop.permute.xlu0 %1398 }
 0x345   :  { %1645 = vmatprep.mubr.bf16.mxu0 %v1724_v15  ;;  %1653 = vmatprep.mubr.bf16.mxu1 %v1725_v41 }
 0x34c   :  { %1646 = vmatmul.mubr.bf16.gmra.mxu0 %v1726_v43  ;;  %1654 = vmatmul.mubr.bf16.gmra.mxu1 %v1727_v44 }
 0x404   :  { %v1643_v4 = vpop.f32.mrf.mxu0  ;;  %v1651_v5 = vpop.f32.mrf.mxu1 }
 0x405   :  { %v1260_v23 = vadd.f32 %v1643_v4, %v1102_v48 }
 0x406   :  { %v1251_v9 = vpop.f32.mrf.mxu0  ;;  %v1283_v13 = vpop.f32.mrf.mxu1 }
 0x407   :  { %v1252_v17 = vadd.f32 %v1251_v9, %v1092_v46  ;;  %v1316_v31 = vmax.f32 %v1260_v23, 0.0  ;;  %v1284_v36 = vadd.f32 %v1283_v13, %v1132_v19  ;;  %v1157_v46 = vpop.permute.xlu1 %1156 }
 0x408   :  { %v1644_v18 = vpop.f32.mrf.mxu0  ;;  %v1652_v20 = vpop.f32.mrf.mxu1 }
 0x409   :  { %v1314_v27 = vmax.f32 %v1252_v17, 0.0  ;;  %v1263_v25 = vadd.f32 %v1644_v18, %v1107_v50  ;;  %v1428_v37 = vmul.f32 %v1359_v42, %v1316_v31  ;;  %v1292_v42 = vadd.f32 %v1651_v5, %v1142_v62 }
 0x40a   :  { %v1254_v3 = vpop.f32.mrf.mxu0  ;;  %v1286_v52 = vpop.f32.mrf.mxu1  ;;  %v1295_v9 = vadd.f32 %v1652_v20, %v1147_v22 }
 0x40b   :  { %v1255_v28 = vadd.f32 %v1254_v3, %v1097_v47  ;;  %v1426_v32 = vmul.f32 %v1349_v11, %v1314_v27  ;;  %v1317_v2 = vmax.f32 %v1263_v25, 0.0  ;;  %v1287_v47 = vadd.f32 %v1286_v52, %v1137_v63  ;;  %v1404_v11 = vpop.permute.xlu0 %1403  ;;  %v1162_v13 = vpop.permute.xlu1 %1161 }
 0x40c   :  { %v1647_v29 = vpop.f32.mrf.mxu0  ;;  %v1655_v16 = vpop.f32.mrf.mxu1  ;;  %v1325_v27 = vmax.f32 %v1295_v9, 0.0 }
 0x40d   :  { %v1315_v59 = vmax.f32 %v1255_v28, 0.0  ;;  %v1276_v39 = vadd.f32 %v1647_v29, %v1122_v56  ;;  %v1429_v0 = vmul.f32 %v1364_v54, %v1317_v2  ;;  %v1322_v56 = vmax.f32 %v1284_v36, 0.0 }
 0x40e   :  { %v1267_v12 = vpop.f32.mrf.mxu0  ;;  %v1299_v35 = vpop.f32.mrf.mxu1  ;;  %v1308_v62 = vadd.f32 %v1655_v16, %v1162_v13  ;;  %v1437_v20 = vmul.f32 %v1404_v11, %v1325_v27 }
 0x40f   :  { %v1427_v49 = vmul.f32 %v1354_v53, %v1315_v59  ;;  %v1268_v30 = vadd.f32 %v1267_v12, %v1112_v51  ;;  %v1320_v15 = vmax.f32 %v1276_v39, 0.0  ;;  %v1434_v18 = vmul.f32 %v1389_v6, %v1322_v56  ;;  %v1409_v63 = vpop.permute.xlu0 %1408  ;;  %v1167_v29 = vpop.permute.xlu1 %1166 }
 0x410   :  { %v1648_v33 = vpop.f32.mrf.mxu0  ;;  %v1656_v53 = vpop.f32.mrf.mxu1  ;;  %v1300_v23 = vadd.f32 %v1299_v35, %v1152_v21  ;;  %v1328_v12 = vmax.f32 %v1308_v62, 0.0 }
 0x411   :  { %v1442_v38 = vadd.f32 %v1427_v49, %v1426_v32  ;;  %v1318_v40 = vmax.f32 %v1268_v30, 0.0  ;;  %v1279_v34 = vadd.f32 %v1648_v33, %v1127_v58  ;;  %v1432_v4 = vmul.f32 %v1379_v60, %v1320_v15 }
 0x412   :  { %v1270_v24 = vpop.f32.mrf.mxu0  ;;  %v1323_v58 = vmax.f32 %v1287_v47, 0.0  ;;  %v1302_v17 = vpop.f32.mrf.mxu1  ;;  %v1326_v5 = vmax.f32 %v1300_v23, 0.0  ;;  %v1311_v22 = vadd.f32 %v1656_v53, %v1167_v29 }
 0x413   :  { %v1443_v45 = vadd.f32 %v1442_v38, %v1428_v37  ;;  %v1271_v10 = vadd.f32 %v1270_v24, %v1117_v8  ;;  %v1430_v41 = vmul.f32 %v1369_v57, %v1318_v40  ;;  %v1321_v50 = vmax.f32 %v1279_v34, 0.0  ;;  %v1414_v59 = vpop.permute.xlu0 %1413  ;;  %v1419_v30 = vpop.permute.xlu1 %1418 }
 0x414   :  { %v1324_v57 = vmax.f32 %v1292_v42, 0.0  ;;  %v1435_v25 = vmul.f32 %v1394_v26, %v1323_v58  ;;  %v1303_v28 = vadd.f32 %v1302_v17, %v1157_v46  ;;  %v1438_v32 = vmul.f32 %v1409_v63, %v1326_v5 }
 0x415   :  { %v1444_v43 = vadd.f32 %v1443_v45, %v1429_v0  ;;  %v1319_v44 = vmax.f32 %v1271_v10, 0.0  ;;  %v1433_v8 = vmul.f32 %v1384_v1, %v1321_v50  ;;  %v1329_v21 = vmax.f32 %v1311_v22, 0.0 }
 0x416   :  { %v1436_v52 = vmul.f32 %v1399_v55, %v1324_v57  ;;  %v1327_v1 = vmax.f32 %v1303_v28, 0.0  ;;  %v1440_v26 = vmul.f32 %v1419_v30, %v1328_v12 }
 0x417   :  { %v1445_v48 = vadd.f32 %v1444_v43, %v1430_v41  ;;  %v1431_v51 = vmul.f32 %v1374_v14, %v1319_v44  ;;  %v1424_v37 = vpop.permute.xlu0 %1423  ;;  %v1467_v45 = vpop.permute.xlu1 %1466 }
 0x418   :  { %v1439_v2 = vmul.f32 %v1414_v59, %v1327_v1  ;;  %v1441_v38 = vmul.f32 %v1424_v37, %v1329_v21  ;;  %v1472_v10 = vrot.slane %v1467_v45, %v141_v7 }
 0x419   :  { %v1446_v54 = vadd.f32 %v1445_v48, %v1431_v51 }
 0x41b   :  { %v1447_v19 = vadd.f32 %v1446_v54, %v1432_v4 }
 0x41d   :  { %v1448_v3 = vadd.f32 %v1447_v19, %v1433_v8 }
 0x41f   :  { %v1449_v14 = vadd.f32 %v1448_v3, %v1434_v18 }
 0x421   :  { %v1450_v60 = vadd.f32 %v1449_v14, %v1435_v25 }
 0x423   :  { %v1451_v31 = vadd.f32 %v1450_v60, %v1436_v52 }
 0x425   :  { %v1452_v6 = vadd.f32 %v1451_v31, %v1437_v20 }
 0x427   :  { %v1453_v49 = vadd.f32 %v1452_v6, %v1438_v32 }
 0x429   :  { %v1454_v33 = vadd.f32 %v1453_v49, %v1439_v2 }
 0x42b   :  { %v1455_v16 = vadd.f32 %v1454_v33, %v1440_v26 }
 0x42d   :  { %v1456_v39 = vadd.f32 %v1455_v16, %v1441_v38 }
 0x42f   :  { %v1457_v55 = vrot.slane %v1456_v39, 4 }
 0x431   :  { %v1458_v40 = vadd.f32 %v1457_v55, %v1456_v39 }
 0x433   :  { %v1459_v24 = vrot.slane %v1458_v40, 2 }
 0x435   :  { %v1460_v0 = vadd.f32 %v1459_v24, %v1458_v40 }
 0x437   :  { %v1461_v34 = vrot.slane %v1460_v0, 1 }
 0x439   :  { %v1462_v36 = vadd.f32 %v1461_v34, %v1460_v0 }
 0x43b   :  { %v1473_v35 = vadd.f32 %v1472_v10, %v1462_v36 }
 0x43d   :  { %1474 = vst [vmem:[#allocation3] sm:$0x1] %v1473_v35 }
 0x43e   :  { %1739 = shalt.err (!%p1736_p4)
}
 0x43f   :  { %1484 = dma.vmem_to_hbm [thread:$0]  %s1482_s28, 16, %s2382_s11, [#allocation4]  }
 0x440   :  { %1748 = dma.done.wait [#allocation4], 16  }
 0x441   :  { %1749 = vsyncadd [#allocation4], 4294967280 }
 0x442   :  { %1488 = vsyncpa [#allocation4], 1 }

</bundles_post_ra>
